<compile_context>
chip_gen: v7x
topology: tpu7x:2x2x1
jax: 0.10.0
libtpu: 0.0.40
codegen_flags: <defaults>
</compile_context>

<pallas_src>
import jax
import jax.numpy as jnp
from jax import lax
from jax.experimental import pallas as pl
from jax.experimental.pallas import tpu as pltpu


def _temporal_block_body(x_ref, w1_ref, b1_ref, w2_ref, b2_ref,
                         wd_ref, bd_ref, o_ref, *,
                         K, dilation, padding, L, L1, L2, L2p, Nb,
                         compute_dtype):
    """Processes Nb batch elements per grid step with ONE matmul per conv.

    x_ref  : (Nb, Cin, L)        input in compute dtype
    w1_ref : (Cout, K*Cin)       fused conv1 weights (tap-major columns)
    w2_ref : (Cout, K*Cout)      fused conv2 weights
    wd_ref : (Cout, Cin) | None  1x1 downsample weights
    b*_ref : (Cout, 1)           biases, f32
    o_ref  : (Nb, Cout, L2p)     output, time padded up to a multiple of 128
    """
    cdt = compute_dtype
    f32 = jnp.float32
    d = dilation
    p = padding

    w1 = w1_ref[...]
    w2 = w2_ref[...]
    b1 = b1_ref[...]
    b2 = b2_ref[...]
    Cout = w1.shape[0]
    has_ds = wd_ref is not None

    def pad_time(a):
        # zero-pad along time (lanes) in registers; no HBM round trip
        if p == 0:
            return a
        z = jnp.zeros((a.shape[0], p), a.dtype)
        return jnp.concatenate([z, a, z], axis=1)

    def lane_cat(parts):
        return parts[0] if len(parts) == 1 else jnp.concatenate(parts, axis=1)

    def conv_rhs(chunks, L_out):
        # chunks: Nb arrays of shape (C, L_in) in compute dtype (unpadded).
        # Stack the K dilated taps along sublanes and the Nb batch elements
        # along lanes -> fused, lane-batched RHS of shape (K*C, Nb*L_out).
        cols = []
        for cb in chunks:
            cp = pad_time(cb)
            taps = [cp[:, k * d:k * d + L_out] for k in range(K)]
            cols.append(taps[0] if K == 1 else jnp.concatenate(taps, axis=0))
        return lane_cat(cols)

    # ---- conv1 + bias + ReLU: one MXU matmul for all Nb batch elements ----
    xs = [x_ref[b] for b in range(Nb)]                      # (Cin, L) each
    h1 = jnp.dot(w1, conv_rhs(xs, L1), preferred_element_type=f32)
    h1 = jnp.maximum(h1 + b1, 0.0)                          # (Cout, Nb*L1) f32

    # ---- conv2 + bias + ReLU (h1 never leaves VMEM/registers) ----
    h1c = h1.astype(cdt)
    h1s = [h1c[:, b * L1:(b + 1) * L1] for b in range(Nb)]
    h2 = jnp.dot(w2, conv_rhs(h1s, L2), preferred_element_type=f32)
    h2 = jnp.maximum(h2 + b2, 0.0)                          # (Cout, Nb*L2) f32

    # ---- identity path: 1x1 conv if channel counts differ ----
    if has_ds:
        wd = wd_ref[...]
        bd = bd_ref[...]
        ident = jnp.dot(wd, lane_cat(xs), preferred_element_type=f32) + bd
        idents = [ident[:, b * L:(b + 1) * L] for b in range(Nb)]
    else:
        # Cin == Cout: skip connection is the (compute-dtype-rounded) input
        # upcast back to f32.
        idents = [xb.astype(f32) for xb in xs]

    # crop / zero-pad the identity time dim to L2 (matches the PyTorch code)
    if L > L2:
        idents = [ib[:, :L2] for ib in idents]
    elif L < L2:
        ztail = jnp.zeros((Cout, L2 - L), f32)
        idents = [jnp.concatenate([ib, ztail], axis=1) for ib in idents]

    res = jnp.maximum(h2 + lane_cat(idents), 0.0)           # (Cout, Nb*L2) f32

    # ---- lane-dense stores: one full-width (Cout, L2p) store per element ----
    zpad = jnp.zeros((Cout, L2p - L2), f32) if L2p > L2 else None
    for b in range(Nb):
        rb = res[:, b * L2:(b + 1) * L2]
        if zpad is not None:
            rb = jnp.concatenate([rb, zpad], axis=1)
        o_ref[b] = rb


def _make_kernel(has_downsample, **static):
    if has_downsample:
        def kernel(x_ref, w1_ref, b1_ref, w2_ref, b2_ref, wd_ref, bd_ref,
                   o_ref):
            _temporal_block_body(x_ref, w1_ref, b1_ref, w2_ref, b2_ref,
                                 wd_ref, bd_ref, o_ref, **static)
    else:
        def kernel(x_ref, w1_ref, b1_ref, w2_ref, b2_ref, o_ref):
            _temporal_block_body(x_ref, w1_ref, b1_ref, w2_ref, b2_ref,
                                 None, None, o_ref, **static)
    return kernel


def _largest_divisor_at_most(n, cap):
    cap = int(max(1, min(cap, n)))
    for cand in range(cap, 0, -1):
        if n % cand == 0:
            return cand
    return 1


def temporal_block(x, w1, b1, w2, b2, wd, bd, *, kernel_size, stride,
                   dilation, padding, compute_dtype=jnp.bfloat16):
    """x: (N, Cin, L).  Returns (N, Cout, L2) float32."""
    assert stride == 1  # TODO(synk): general stride needs strided time slices
    N, Cin, L = x.shape
    Cout = w1.shape[0]
    K = kernel_size
    L1 = (L + 2 * padding - dilation * (K - 1) - 1) // stride + 1
    L2 = (L1 + 2 * padding - dilation * (K - 1) - 1) // stride + 1
    assert L1 > 0 and L2 > 0
    has_downsample = wd is not None
    if not has_downsample:
        assert Cin == Cout, "identity residual requires Cin == Cout"

    # Lane-dense output: pad the output time dim up to a multiple of 128 so
    # every store in the kernel is an unmasked full-width vst; slice after.
    L2p = -(-L2 // 128) * 128

    # ---- VMEM budget (intermediate-aware) and batch blocking -------------
    try:
        vmem_cap = int(getattr(pltpu.get_tpu_info(), "vmem_capacity_bytes",
                               64 << 20))
    except Exception:
        vmem_cap = 64 << 20                     # conservative (v7x-sized)
    vmem_limit = max(32 << 20, min(vmem_cap * 3 // 4, 100 << 20))
    step_budget = min(vmem_limit // 2, 32 << 20)

    cdb = jnp.dtype(compute_dtype).itemsize
    per_elem = (
        2 * Cin * L * cdb                          # x block (double-buffered)
        + 2 * Cout * L2p * 4                       # out block (double-buffered)
        + Cin * (L + 2 * padding) * cdb            # padded x
        + K * Cin * L1 * cdb                       # stacked conv1 RHS
        + Cout * L1 * (4 + cdb)                    # h1 f32 + compute-dtype copy
        + Cout * (L1 + 2 * padding) * cdb          # padded h1
        + K * Cout * L2 * cdb                      # stacked conv2 RHS
        + 3 * Cout * L2 * 4                        # h2, identity, residual
        + Cout * max(L2p - L2, 0) * 4              # lane padding of the store
        + (Cout * L * 4 if has_downsample else 0)  # downsample identity
    )
    fixed = 2 * cdb * (Cout * K * Cin + Cout * K * Cout) + 2 * 4 * 2 * Cout
    if has_downsample:
        fixed += 2 * cdb * Cout * Cin + 2 * 4 * Cout

    nb_cap = (step_budget - fixed) // max(per_elem, 1)
    nb_cap = min(nb_cap, 32)                 # keep the static unroll bounded
    nb_cap = min(nb_cap, max(1, N // 2))     # grid >= 2 -> both v7x TCs busy
    Nb = _largest_divisor_at_most(N, nb_cap)
    grid = (N // Nb,)

    # ---- operand prep -----------------------------------------------------
    # x is cast in the wrapper and DMA'd in compute dtype (halves HBM traffic
    # for bf16).  Fused-tap weight layout: column block k of w*f is the
    # (Cout, C) matrix for tap k, matching the sublane-stacked RHS.
    x_c = x.astype(compute_dtype)
    w1f = jnp.transpose(w1, (0, 2, 1)).reshape(Cout, K * Cin).astype(compute_dtype)
    w2f = jnp.transpose(w2, (0, 2, 1)).reshape(Cout, K * Cout).astype(compute_dtype)
    b1m = b1.reshape(Cout, 1).astype(jnp.float32)
    b2m = b2.reshape(Cout, 1).astype(jnp.float32)

    operands = [x_c, w1f, b1m, w2f, b2m]
    in_specs = [
        pl.BlockSpec((Nb, Cin, L), lambda n: (n, 0, 0)),        # x
        pl.BlockSpec((Cout, K * Cin), lambda n: (0, 0)),        # w1 (fused)
        pl.BlockSpec((Cout, 1), lambda n: (0, 0)),              # b1
        pl.BlockSpec((Cout, K * Cout), lambda n: (0, 0)),       # w2 (fused)
        pl.BlockSpec((Cout, 1), lambda n: (0, 0)),              # b2
    ]

    static = dict(K=K, dilation=dilation, padding=padding, L=L, L1=L1, L2=L2,
                  L2p=L2p, Nb=Nb, compute_dtype=compute_dtype)
    if has_downsample:
        wdf = wd[:, :, 0].astype(compute_dtype)                 # (Cout, Cin)
        bdm = bd.reshape(Cout, 1).astype(jnp.float32)
        operands += [wdf, bdm]
        in_specs += [pl.BlockSpec((Cout, Cin), lambda n: (0, 0)),
                     pl.BlockSpec((Cout, 1), lambda n: (0, 0))]
    kern = _make_kernel(has_downsample, **static)

    out = pl.pallas_call(
        kern,
        out_shape=jax.ShapeDtypeStruct((N, Cout, L2p), jnp.float32),
        grid_spec=pltpu.PrefetchScalarGridSpec(
            num_scalar_prefetch=0,
            grid=grid,
            in_specs=in_specs,
            out_specs=pl.BlockSpec((Nb, Cout, L2p), lambda n: (n, 0, 0)),
        ),
        compiler_params=pltpu.CompilerParams(
            dimension_semantics=("parallel",),
            vmem_limit_bytes=int(vmem_limit)),
    )(*operands)

    # TODO(synk): consumers that accept the 128-padded time layout can take
    # `out` directly and skip this slice (one extra HBM pass of the output).
    return out[:, :, :L2] if L2p != L2 else out


def temporal_block_ref(x, w1, b1, w2, b2, wd, bd, *,
                       kernel_size, stride, dilation, padding):
    """Pure-JAX reference mirroring the PyTorch forward exactly."""
    dn = ('NCH', 'OIH', 'NCH')

    def conv(inp, w, b, d, p):
        y = lax.conv_general_dilated(inp, w, window_strides=(stride,),
                                     padding=[(p, p)], rhs_dilation=(d,),
                                     dimension_numbers=dn)
        return y + b.reshape(1, -1, 1)

    out = jax.nn.relu(conv(x, w1, b1, dilation, padding))
    out = jax.nn.relu(conv(out, w2, b2, dilation, padding))
    identity = x
    if wd is not None:
        identity = conv(x, wd, bd, 1, 0)
    Lo, Li = out.shape[2], identity.shape[2]
    if Li < Lo:
        identity = jnp.pad(identity, ((0, 0), (0, 0), (0, Lo - Li)))
    elif Li > Lo:
        identity = identity[:, :, :Lo]
    return jax.nn.relu(out + identity)


def _run_case(key, N, Cin, Cout, L, K, stride, dilation, padding,
              downsample, compute_dtype, atol, rtol):
    ks = jax.random.split(key, 7)
    x = jax.random.normal(ks[0], (N, Cin, L), jnp.float32)
    w1 = 0.1 * jax.random.normal(ks[1], (Cout, Cin, K), jnp.float32)
    b1 = 0.1 * jax.random.normal(ks[2], (Cout,), jnp.float32)
    w2 = 0.1 * jax.random.normal(ks[3], (Cout, Cout, K), jnp.float32)
    b2 = 0.1 * jax.random.normal(ks[4], (Cout,), jnp.float32)
    if downsample:
        wd = 0.1 * jax.random.normal(ks[5], (Cout, Cin, 1), jnp.float32)
        bd = 0.1 * jax.random.normal(ks[6], (Cout,), jnp.float32)
    else:
        wd, bd = None, None

    out = temporal_block(x, w1, b1, w2, b2, wd, bd,
                         kernel_size=K, stride=stride, dilation=dilation,
                         padding=padding, compute_dtype=compute_dtype)
    out = jax.block_until_ready(out)
    ref = temporal_block_ref(x, w1, b1, w2, b2, wd, bd,
                             kernel_size=K, stride=stride,
                             dilation=dilation, padding=padding)
    assert out.shape == ref.shape, (out.shape, ref.shape)
    err = float(jnp.max(jnp.abs(out - ref)))
    assert jnp.allclose(out, ref, atol=atol, rtol=rtol), err


if __name__ == "__main__":
    key = jax.random.PRNGKey(0)
    k_a, k_b, k_c = jax.random.split(key, 3)

    # Case A: input_size != output_size (downsample branch), padding large
    # enough that the identity gets right-padded — matches
    # TemporalBlock(4, 8, kernel_size=3, stride=1, dilation=1, padding=2).
    _run_case(k_a, N=2, Cin=4, Cout=8, L=16, K=3, stride=1, dilation=1,
              padding=2, downsample=True, compute_dtype=jnp.float32,
              atol=5e-3, rtol=5e-3)

    # Case A with bf16 matmul operands (recommended default), looser tol.
    _run_case(k_a, N=2, Cin=4, Cout=8, L=16, K=3, stride=1, dilation=1,
              padding=2, downsample=True, compute_dtype=jnp.bfloat16,
              atol=5e-2, rtol=5e-2)

    # Case B: input_size == output_size (no downsample, no wd/bd DMA) and
    # padding=0 so the identity gets cropped.
    _run_case(k_b, N=2, Cin=8, Cout=8, L=16, K=3, stride=1, dilation=1,
              padding=0, downsample=False, compute_dtype=jnp.float32,
              atol=5e-3, rtol=5e-3)

    # Case C: larger batch -> exercises Nb > 1 lane-batched matmuls and
    # dilation > 1 tap slicing, in bf16.
    _run_case(k_c, N=8, Cin=16, Cout=32, L=64, K=3, stride=1, dilation=2,
              padding=4, downsample=True, compute_dtype=jnp.bfloat16,
              atol=5e-2, rtol=5e-2)

    print("KERNEL_OK")
</pallas_src>

<mosaic_0001>
module attributes {stable_mosaic.version = 11 : i64} {
  func.func @kernel(%arg0: i32, %arg1: memref<1x4x16xf32, #tpu.memory_space<vmem>>, %arg2: memref<8x12xf32, #tpu.memory_space<vmem>>, %arg3: memref<8x1xf32, #tpu.memory_space<vmem>>, %arg4: memref<8x24xf32, #tpu.memory_space<vmem>>, %arg5: memref<8x1xf32, #tpu.memory_space<vmem>>, %arg6: memref<8x4xf32, #tpu.memory_space<vmem>>, %arg7: memref<8x1xf32, #tpu.memory_space<vmem>>, %arg8: memref<1x8x128xf32, #tpu.memory_space<vmem>>) attributes {dimension_semantics = [#tpu.dimension_semantics<parallel>], iteration_bounds = array<i64: 2>, scalar_prefetch = 0 : i64, scratch_operands = 0 : i64, tpu.core_type = #tpu.core_type<tc>, window_params = [{transform_indices = @transform_0, window_bounds = array<i64: 1, 4, 16>}, {pipeline_mode = #tpu.pipeline_mode<synchronous>, transform_indices = @transform_1, window_bounds = array<i64: 8, 12>}, {pipeline_mode = #tpu.pipeline_mode<synchronous>, transform_indices = @transform_2, window_bounds = array<i64: 8, 1>}, {pipeline_mode = #tpu.pipeline_mode<synchronous>, transform_indices = @transform_3, window_bounds = array<i64: 8, 24>}, {pipeline_mode = #tpu.pipeline_mode<synchronous>, transform_indices = @transform_4, window_bounds = array<i64: 8, 1>}, {pipeline_mode = #tpu.pipeline_mode<synchronous>, transform_indices = @transform_5, window_bounds = array<i64: 8, 4>}, {pipeline_mode = #tpu.pipeline_mode<synchronous>, transform_indices = @transform_6, window_bounds = array<i64: 8, 1>}, {transform_indices = @transform_7, window_bounds = array<i64: 1, 8, 128>}]} {
    %c0 = arith.constant 0 : index
    %c0_0 = arith.constant 0 : index
    %0 = vector.load %arg2[%c0, %c0_0] : memref<8x12xf32, #tpu.memory_space<vmem>>, vector<8x12xf32>
    %c0_1 = arith.constant 0 : index
    %c0_2 = arith.constant 0 : index
    %1 = vector.load %arg4[%c0_1, %c0_2] : memref<8x24xf32, #tpu.memory_space<vmem>>, vector<8x24xf32>
    %c0_3 = arith.constant 0 : index
    %c0_4 = arith.constant 0 : index
    %2 = vector.load %arg3[%c0_3, %c0_4] : memref<8x1xf32, #tpu.memory_space<vmem>>, vector<8x1xf32>
    %c0_5 = arith.constant 0 : index
    %c0_6 = arith.constant 0 : index
    %3 = vector.load %arg5[%c0_5, %c0_6] : memref<8x1xf32, #tpu.memory_space<vmem>>, vector<8x1xf32>
    %c0_7 = arith.constant 0 : index
    %c0_8 = arith.constant 0 : index
    %c0_9 = arith.constant 0 : index
    %4 = vector.load %arg1[%c0_7, %c0_8, %c0_9] : memref<1x4x16xf32, #tpu.memory_space<vmem>>, vector<1x4x16xf32>
    %5 = vector.shape_cast %4 : vector<1x4x16xf32> to vector<4x16xf32>
    %cst = arith.constant 0.000000e+00 : f32
    %6 = vector.broadcast %cst : f32 to vector<4x2xf32>
    %7 = tpu.concatenate %6, %5, %6 in 1 : vector<4x2xf32>, vector<4x16xf32>, vector<4x2xf32> -> vector<4x20xf32>
    %8 = vector.extract_strided_slice %7 {offsets = [0, 0], sizes = [4, 18], strides = [1, 1]} : vector<4x20xf32> to vector<4x18xf32>
    %9 = vector.extract_strided_slice %7 {offsets = [0, 1], sizes = [4, 18], strides = [1, 1]} : vector<4x20xf32> to vector<4x18xf32>
    %10 = vector.extract_strided_slice %7 {offsets = [0, 2], sizes = [4, 18], strides = [1, 1]} : vector<4x20xf32> to vector<4x18xf32>
    %11 = tpu.concatenate %8, %9, %10 in 0 : vector<4x18xf32>, vector<4x18xf32>, vector<4x18xf32> -> vector<12x18xf32>
    %cst_10 = arith.constant dense<0.000000e+00> : vector<8x18xf32>
    %12 = tpu.matmul %0, %11, %cst_10 {dimension_numbers = #tpu.dot_dimension_numbers<[1], [0], [0], [1], [0, 0, 1, 1], [], []>} : vector<8x12xf32>, vector<12x18xf32>, vector<8x18xf32> -> vector<8x18xf32>
    %13 = vector.broadcast %2 : vector<8x1xf32> to vector<8x18xf32>
    %14 = arith.addf %12, %13 : vector<8x18xf32>
    %cst_11 = arith.constant 0.000000e+00 : f32
    %15 = vector.broadcast %cst_11 : f32 to vector<8x18xf32>
    %16 = arith.maximumf %14, %15 : vector<8x18xf32>
    %cst_12 = arith.constant 0.000000e+00 : f32
    %17 = vector.broadcast %cst_12 : f32 to vector<8x2xf32>
    %18 = tpu.concatenate %17, %16, %17 in 1 : vector<8x2xf32>, vector<8x18xf32>, vector<8x2xf32> -> vector<8x22xf32>
    %19 = vector.extract_strided_slice %18 {offsets = [0, 0], sizes = [8, 20], strides = [1, 1]} : vector<8x22xf32> to vector<8x20xf32>
    %20 = vector.extract_strided_slice %18 {offsets = [0, 1], sizes = [8, 20], strides = [1, 1]} : vector<8x22xf32> to vector<8x20xf32>
    %21 = vector.extract_strided_slice %18 {offsets = [0, 2], sizes = [8, 20], strides = [1, 1]} : vector<8x22xf32> to vector<8x20xf32>
    %22 = tpu.concatenate %19, %20, %21 in 0 : vector<8x20xf32>, vector<8x20xf32>, vector<8x20xf32> -> vector<24x20xf32>
    %cst_13 = arith.constant dense<0.000000e+00> : vector<8x20xf32>
    %23 = tpu.matmul %1, %22, %cst_13 {dimension_numbers = #tpu.dot_dimension_numbers<[1], [0], [0], [1], [0, 0, 1, 1], [], []>} : vector<8x24xf32>, vector<24x20xf32>, vector<8x20xf32> -> vector<8x20xf32>
    %24 = vector.broadcast %3 : vector<8x1xf32> to vector<8x20xf32>
    %25 = arith.addf %23, %24 : vector<8x20xf32>
    %cst_14 = arith.constant 0.000000e+00 : f32
    %26 = vector.broadcast %cst_14 : f32 to vector<8x20xf32>
    %27 = arith.maximumf %25, %26 : vector<8x20xf32>
    %c0_15 = arith.constant 0 : index
    %c0_16 = arith.constant 0 : index
    %28 = vector.load %arg6[%c0_15, %c0_16] : memref<8x4xf32, #tpu.memory_space<vmem>>, vector<8x4xf32>
    %c0_17 = arith.constant 0 : index
    %c0_18 = arith.constant 0 : index
    %29 = vector.load %arg7[%c0_17, %c0_18] : memref<8x1xf32, #tpu.memory_space<vmem>>, vector<8x1xf32>
    %cst_19 = arith.constant dense<0.000000e+00> : vector<8x16xf32>
    %30 = tpu.matmul %28, %5, %cst_19 {dimension_numbers = #tpu.dot_dimension_numbers<[1], [0], [0], [1], [0, 0, 1, 1], [], []>} : vector<8x4xf32>, vector<4x16xf32>, vector<8x16xf32> -> vector<8x16xf32>
    %31 = vector.broadcast %29 : vector<8x1xf32> to vector<8x16xf32>
    %32 = arith.addf %30, %31 : vector<8x16xf32>
    %cst_20 = arith.constant 0.000000e+00 : f32
    %33 = vector.broadcast %cst_20 : f32 to vector<8x4xf32>
    %34 = tpu.concatenate %32, %33 in 1 : vector<8x16xf32>, vector<8x4xf32> -> vector<8x20xf32>
    %35 = arith.addf %27, %34 : vector<8x20xf32>
    %cst_21 = arith.constant 0.000000e+00 : f32
    %36 = vector.broadcast %cst_21 : f32 to vector<8x20xf32>
    %37 = arith.maximumf %35, %36 : vector<8x20xf32>
    %cst_22 = arith.constant 0.000000e+00 : f32
    %38 = vector.broadcast %cst_22 : f32 to vector<8x108xf32>
    %39 = tpu.concatenate %37, %38 in 1 : vector<8x20xf32>, vector<8x108xf32> -> vector<8x128xf32>
    %c0_23 = arith.constant 0 : index
    %c0_24 = arith.constant 0 : index
    %c0_25 = arith.constant 0 : index
    %40 = vector.load %arg8[%c0_23, %c0_24, %c0_25] : memref<1x8x128xf32, #tpu.memory_space<vmem>>, vector<1x8x128xf32>
    %41 = vector.shape_cast %40 : vector<1x8x128xf32> to vector<8x128xf32>
    %42 = vector.shape_cast %39 : vector<8x128xf32> to vector<1x8x128xf32>
    tpu.vector_store %arg8[%c0_23, %c0_24, %c0_25], %42 {strides = array<i32>} : memref<1x8x128xf32, #tpu.memory_space<vmem>>, vector<1x8x128xf32>,
    return
  }
  func.func @transform_0(%arg0: i32) -> (i32, i32, i32) {
    %c0_i32 = arith.constant 0 : i32
    %c0_i32_0 = arith.constant 0 : i32
    %c0_i32_1 = arith.constant 0 : i32
    return %arg0, %c0_i32, %c0_i32_0 : i32, i32, i32
  }
  func.func @transform_1(%arg0: i32) -> (i32, i32) {
    %c0_i32 = arith.constant 0 : i32
    %c0_i32_0 = arith.constant 0 : i32
    %c0_i32_1 = arith.constant 0 : i32
    return %c0_i32, %c0_i32_0 : i32, i32
  }
  func.func @transform_2(%arg0: i32) -> (i32, i32) {
    %c0_i32 = arith.constant 0 : i32
    %c0_i32_0 = arith.constant 0 : i32
    %c0_i32_1 = arith.constant 0 : i32
    return %c0_i32, %c0_i32_0 : i32, i32
  }
  func.func @transform_3(%arg0: i32) -> (i32, i32) {
    %c0_i32 = arith.constant 0 : i32
    %c0_i32_0 = arith.constant 0 : i32
    %c0_i32_1 = arith.constant 0 : i32
    return %c0_i32, %c0_i32_0 : i32, i32
  }
  func.func @transform_4(%arg0: i32) -> (i32, i32) {
    %c0_i32 = arith.constant 0 : i32
    %c0_i32_0 = arith.constant 0 : i32
    %c0_i32_1 = arith.constant 0 : i32
    return %c0_i32, %c0_i32_0 : i32, i32
  }
  func.func @transform_5(%arg0: i32) -> (i32, i32) {
    %c0_i32 = arith.constant 0 : i32
    %c0_i32_0 = arith.constant 0 : i32
    %c0_i32_1 = arith.constant 0 : i32
    return %c0_i32, %c0_i32_0 : i32, i32
  }
  func.func @transform_6(%arg0: i32) -> (i32, i32) {
    %c0_i32 = arith.constant 0 : i32
    %c0_i32_0 = arith.constant 0 : i32
    %c0_i32_1 = arith.constant 0 : i32
    return %c0_i32, %c0_i32_0 : i32, i32
  }
  func.func @transform_7(%arg0: i32) -> (i32, i32, i32) {
    %c0_i32 = arith.constant 0 : i32
    %c0_i32_0 = arith.constant 0 : i32
    %c0_i32_1 = arith.constant 0 : i32
    return %arg0, %c0_i32, %c0_i32_0 : i32, i32, i32
  }
}

</mosaic_0001>

<bundles_post_ra>
// kernel: tpu_custom_call.1
= control target key start
LH: loop header
LB: loop body
LE: loop exit
PB: predicated region body
PF: predicated region fallthrough
CT: control target
= control target key end

     0   :  { %12 = vsyncpa [#allocation3], 0  ;;  %s984_s0 = inlined_call_operand.vmem [shape: f32[2,4,16], index: 0, kind: input, shape index: {}]   ;;  %s985_s1 = inlined_call_operand.vmem [shape: f32[8,12], index: 1, kind: input, shape index: {}]   ;;  %s986_s2 = inlined_call_operand.vmem [shape: f32[8,1], index: 2, kind: input, shape index: {}]   ;;  %s987_s3 = inlined_call_operand.vmem [shape: f32[8,24], index: 3, kind: input, shape index: {}]   ;;  %s988_s4 = inlined_call_operand.vmem [shape: f32[8,1], index: 4, kind: input, shape index: {}]   ;;  %s989_s5 = inlined_call_operand.vmem [shape: f32[8,4], index: 5, kind: input, shape index: {}]   ;;  %s990_s6 = inlined_call_operand.vmem [shape: f32[8,1], index: 6, kind: input, shape index: {}]   ;;  %s991_s7 = inlined_call_operand.hbm [shape: f32[2,8,128], index: 7, kind: output, shape index: {}]  }
   0x1   :  { %14 = vsyncpa [#allocation3 + $0x1], 0  ;;  %s850_s24 = smov 0   ;;  %s852_s25 = smov 0  }
   0x2   :  { %s854_s26 = smov 0   ;;  %s856_s27 = smov 0  }
   0x3 LB: > { %s871_s28 = sadd.s32 4294967295, %s799_s27   ;;  %s634_s29 = sadd.s32 4294967294, %s799_s27   ;;  %s799_s27 = sphi %s856_s27, %s997_s27   ;;  %s795_s26 = sphi %s854_s26, %s996_s26   ;;  %s791_s25 = sphi %s852_s25, %s995_s25   ;;  %s787_s24 = sphi %s850_s24, %s994_s24  }
   0x4   : > { %s875_s30 = sadd.s32 1, %s799_s27   ;;  %s179_s8 = sadd.s32 1, %s795_s26 }
   0x5   : > { %s176_s9 = ssub.s32 %s799_s27, %s875_s30  ;;  %p189_p0 = scmp.ne.s32.totalorder %s795_s26, %s791_s25 }
   0x6   : > { %p177_p1 = scmp.eq.s32.totalorder %s176_s9, 0  ;;  %p190_p2 = scmp.eq.s32.totalorder %s871_s28, 1 }
   0x7   : > { %p195_p3 = scmp.ne.s32.totalorder %s791_s25, %s787_s24  ;;  %p196_p4 = scmp.eq.s32.totalorder %s634_s29, 1 }
   0x8   : > { %s886_s10 = scalar_select %p177_p1, %s795_s26, %s179_s8  }
   0x9   : > { %p888_p5 = por %p190_p2, %p189_p0  ;;  %p892_p6 = por %p196_p4, %p195_p3 }
   0xa   : > { %p637_p7 = scmp.ge.s32.totalorder %s799_s27, 1  ;;  %p239_p8 = scmp.lt.s32.totalorder %s799_s27, 3 }
   0xc   : > { %p240_p9 = pnand %p637_p7, %p239_p8 }
   0xd   : > { %p270_p10 = scmp.lt.s32.totalorder (!%p240_p9), %s871_s28, 1  ;;  %s801_s18 = smov (!%p240_p9), 2   ;;  %v802_v1 = vmov (!%p240_p9), 0.0|0.0   ;;  %vm803_vm0 = vmmov (!%p240_p9), 0   ;;  %v804_v2 = vmov (!%p240_p9), 0.0   ;;  %vm283_vm1 = vcmask (!%p240_p9), 15360  }
   0xe   : > { %243 = sbr.rel (%p240_p9) target bundleno = 956 (0x3bc), region = 48  ;;  %680 = vmatprep.subr.bf16.mxu0 (!%p240_p9), %v802_v1  ;;  %684 = vmatprep.subr.bf16.mxu1 (!%p240_p9), %v802_v1  ;;  %vm285_vm2 = vcmask (!%p240_p9), 146432   ;;  %v805_v3 = vmov (!%p240_p9), 0   ;;  %s806_s19 = smov (!%p240_p9), 126   ;;  %v276_v8 = vld [vmem:[%s986_s2] sm:$0xff] (!%p240_p9)  ;;  %vm294_vm3 = vcmask (!%p240_p9), 1043456  }
   0xf   : > { %663 = vmatprep.mubr.msk.f32.mxu0 (!%p240_p9), %vm803_vm0, %v804_v2  ;;  %672 = vmatprep.mubr.msk.f32.mxu1 (!%p240_p9), %vm803_vm0, %v804_v2  ;;  %s807_s22 = smov (!%p240_p9), 127   ;;  %vm808_vm4 = vmmov (!%p240_p9), 1   ;;  %v274_v13 = vld [vmem:[%s985_s1] sm:$0xff] (!%p240_p9)  ;;  %vm301_vm6 = vcmask (!%p240_p9), 97280   ;;  %vm479_vm7 = vcmask (!%p240_p9), 31744   ;;  %vm383_vm8 = vcmask (!%p240_p9), 162816  }
  0x10   : > { %735 = vset.pattern.permute.xlu1 (!%p240_p9), %v805_v3  ;;  %736 = vset.pattern.permute.xlu0 (!%p240_p9), %v805_v3  ;;  %vm682_vm5 = vmpackc.low (!%p240_p9), %vm294_vm3, %vm808_vm4  ;;  %v472_v19 = vld [vmem:[%s989_s5] sm:$0xff] (!%p240_p9)  ;;  %vm397_vm10 = vcmask (!%p240_p9), 195584   ;;  %vm555_vm11 = vcmask (!%p240_p9), 130048   ;;  %s647_s21 = sshll.u32 (!%p240_p9), %s871_s28, 7 }
  0x11   : > { %v277_v23 = vld [vmem:[%s988_s4] sm:$0xff] (!%p240_p9)  ;;  %vm686_vm9 = vmpackc.low (!%p240_p9), %vm808_vm4, %vm383_vm8  ;;  %s941_s9 = scalar_lea.hbm (!%p240_p9), %s991_s7, %s647_s21 }
  0x12   : > { %v473_v24 = vld [vmem:[%s990_s6] sm:$0xff] (!%p240_p9) }
  0x13   : > { %v275_v27 = vld [vmem:[%s987_s3] sm:$0xff] (!%p240_p9) }
  0x15   : > { %s271_s13 = scalar_select %p270_p10, %s871_s28, 1 }
  0x16   : > { %s809_s28 = smov [#allocation2]  }
  0x17   : > { %s639_s14 = sshll.u32 %s271_s13, 2  ;;  %s741_s15 = sshll.u32 %s809_s28, 4  ;;  %s742_s15 = int_to_ptr.vmem [resolvable:$false] %s741_s15 }
  0x18   : > { %s273_s17 = scalar_lea.vmem %s984_s0, %s639_s14  ;;  %s743_s16 = scalar_lea.vmem %s742_s15, 256 }
  0x19   : > { %v278_v0 = vld [vmem:[%s273_s17] sm:$0xf] }
  0x1a   : > { %280 = vrot.lane.b32.xlu0 %v278_v0, %s801_s18 }
  0x8c   : > { %v281_v4 = vpop.permute.xlu0 %280 }
  0x8d   : > { %v284_v5 = vsel %vm283_vm1, 0.0, %v281_v4 }
  0x8e   : > { %v286_v6 = vsel %vm285_vm2, %v284_v5, 0.0 }
  0x8f   : > { %v288_v7 = vrot.slane %v286_v6, 4  ;;  %292 = vrot.lane.b32.xlu1 %v286_v6, %s806_s19 }
  0x91   : > { %289 = vrot.lane.b32.xlu0 %v288_v7, %s807_s22 }
  0x93   : > { %298 = vperm.xlu1 %735, %v276_v8  }
 0x101   : > { %v293_v10 = vpop.permute.xlu1 %292 }
 0x103   : > { %v290_v9 = vpop.permute.xlu0 %289 }
 0x104   : > { %v295_v11 = vsel %vm294_vm3, %v286_v6, %v290_v9 }
 0x105   : > { %v681_v12 = vpack.c.bf16 %v293_v10, %v295_v11 }
 0x107   : > { %683 = vmatpush3.bf16.msk.msra.mxu0 %vm682_vm5, %v681_v12 }
 0x108   : > { %675 = vmatprep.subr.mxu0 %v804_v2 }
 0x10a   : > { %664 = vmatmul.mubr.msk.f32.vlgmr.msra.gmra.mrb[0].mxu0 %vm301_vm6, %v274_v13 }
 0x10b   : > { %676 = vmatpush3.msk.msra.mxu0 %vm294_vm3, %v278_v0  ;;  %677 = vmatprep.mubr.msk.f32.mxu0 %vm803_vm0, %v804_v2 }
 0x10e   : > { %678 = vmatmul.mubr.msk.f32.vlgmr.msra.gmra.mrb[2].mxu0 %vm479_vm7, %v472_v19 }
 0x112   : > { %v299_v14 = vpop.permute.xlu1 %298 }
 0x1dd   : > { %v373_v15 = vpop.f32.mrb[0].mxu0 }
 0x1de   : > { %v374_v16 = vadd.f32 %v373_v15, %v299_v14  ;;  %v665_v17 = vpop.f32.mrb[1].mxu0 }
 0x1e0   : > { %v377_v18 = vmax.f32 %v374_v16, 0.0 }
 0x1e1   : > { %v551_v29 = vpop.f32.mrb[2].mxu0 }
 0x1e2   : > { %379 = vrot.lane.b32.xlu0 %v377_v18, %s801_s18  ;;  %v679_v30 = vpop.f32.mrb[3].mxu0 }
 0x254   : > { %v380_v20 = vpop.permute.xlu0 %379 }
 0x255   : > { %v382_v21 = vsel %vm283_vm1, 0.0, %v380_v20 }
 0x256   : > { %v384_v22 = vsel %vm383_vm8, %v382_v21, 0.0 }
 0x257   : > { %389 = vrot.lane.b32.xlu0 %v384_v22, %s806_s19  ;;  %386 = vrot.lane.b32.xlu1 %v384_v22, %s807_s22  ;;  %s267_s19 = sand.u32 1, %s791_s25  }
 0x258   : > { %s638_s20 = sshll.u32 %s267_s19, 3  ;;  %s562_s13 = scalar_lea.sflag [#allocation3], %s267_s19 }
 0x259   : > { %s269_s22 = scalar_lea.vmem [#allocation2], %s638_s20 }
 0x25a   : > { %s575_s23 = sshll.u32 %s269_s22, 4  ;;  %s943_s23 = int_to_ptr.vmem [resolvable:$true] %s575_s23 }
 0x25b   : > { %394 = vperm.xlu1 %735, %v277_v23   ;;  %476 = vperm.xlu0 %736, %v473_v24   ;;  %s737_s14 = scalar_lea.vmem %s943_s23, 128  ;;  %p744_p0 = scmp.lt.s32.totalorder %s943_s23, %s742_s15 }
 0x25c   : > { %p738_p11 = scmp.ne.s32.totalorder %s943_s23, %s737_s14  ;;  %p745_p1 = scmp.lt.s32.totalorder %s743_s16, %s737_s14 }
 0x25e   : > { %p739_p12 = pnand %p738_p11, %p888_p5  ;;  %p746_p2 = por %p745_p1, %p744_p0 }
 0x260   : > { %p740_p13 = pneg %p739_p12 }
 0x262   : > { %p747_p3 = pnand %p746_p2, %p740_p13 }
 0x2c9   : > { %v387_v25 = vpop.permute.xlu1 %386  ;;  %v390_v28 = vpop.permute.xlu0 %389 }
 0x2ca   : > { %v685_v26 = vpack.c.bf16 %v387_v25, %v382_v21 }
 0x2cc   : > { %687 = vmatpush3.bf16.msk.msra.mxu1 %vm686_vm9, %v685_v26 }
 0x2cd   : > { %670 = vmatprep.subr.mxu1 %v804_v2 }
 0x2d0   : > { %671 = vmatpush3.msra.mxu1 %v390_v28 }
 0x2d1   : > { %673 = vmatmul.mubr.msk.f32.vlgmr.msra.gmra.mrb[0].mxu1 %vm397_vm10, %v275_v27 }
 0x2da   : > { %v477_v31 = vpop.permute.xlu0 %476  ;;  %v395_v33 = vpop.permute.xlu1 %394 }
 0x2db   : > { %v552_v32 = vadd.f32 %v551_v29, %v477_v31 }
 0x2dd   : > { %v556_v37 = vsel %vm555_vm11, %v552_v32, 0.0 }
 0x3a4   : > { %v467_v34 = vpop.f32.mrb[0].mxu1 }
 0x3a5   : > { %v468_v35 = vadd.f32 %v467_v34, %v395_v33  ;;  %v674_v36 = vpop.f32.mrb[1].mxu1 }
 0x3a7   : > { %v471_v38 = vmax.f32 %v468_v35, 0.0 }
 0x3a9   : > { %v557_v39 = vadd.f32 %v556_v37, %v471_v38 }
 0x3ab   : > { %v558_v40 = vmax.f32 %v557_v39, 0.0 }
 0x3ad   : > { %v559_v41 = vsel %vm383_vm8, %v558_v40, 0.0 }
 0x3ae   : > { %560 = vst [vmem:[%s269_s22] sm:$0xff] %v559_v41 }
 0x3af   : > { %750 = shalt.err (!%p747_p3)
}
 0x3b0   : > { %s751_s17 = scalar_lea.hbm %s941_s9, 128  ;;  %s755_s20 = scalar_lea.hbm %s991_s7, 256 }
 0x3b1   : > { %p752_p4 = scmp.ne.s32.totalorder %s941_s9, %s751_s17  ;;  %p756_p9 = scmp.lt.u32.totalorder %s941_s9, %s991_s7 }
 0x3b2   : > { %p757_p10 = scmp.lt.u32.totalorder %s755_s20, %s751_s17  ;;  %p759_p12 = scmp.lt.u32.totalorder %s751_s17, %s941_s9 }
 0x3b3   : > { %p753_p7 = pnand %p752_p4, %p888_p5 }
 0x3b4   : > { %p758_p11 = por %p757_p10, %p756_p9 }
 0x3b5   : > { %p754_p8 = pneg %p753_p7 }
 0x3b6   : > { %p760_p13 = por %p759_p12, %p758_p11 }
 0x3b8   : > { %p761_p0 = pnand %p760_p13, %p754_p8 }
 0x3ba   : > { %764 = shalt.err (!%p761_p0)
}
 0x3bb   : > { %688 = dma.vmem_to_hbm [thread:$0]  (%p888_p5), %s943_s23, 128, %s941_s9, %s562_s13  }
 0x3bc PF: > { %p694_p1 = scmp.ge.s32.totalorder %s799_s27, 2  ;;  %s587_s29 = sand.u32 1, %s787_s24  }
 0x3bd   : > { %s588_s8 = scalar_lea.sflag [#allocation3], %s587_s29 }
 0x3be   : > { %p691_p2 = pnand %p694_p1, %p892_p6 }
 0x3c0   : > { %782 = dma.done.wait (!%p691_p2), %s588_s8, 128  }
 0x3c1   : > { %784 = vsyncadd (!%p691_p2), %s588_s8, 4294967168  ;;  %p17_p3 = scmp.ge.s32.totalorder %s875_s30, 4   ;;  %s994_s24 = smov %s791_s25 }
 0x3c2   : > { %s995_s25 = smov %s795_s26  ;;  %s996_s26 = smov %s886_s10 }
 0x3c3   : > { %s997_s27 = smov %s875_s30  ;;  %19 = sbr.rel (!%p17_p3) target bundleno = 3 (0x3), region = 83 }
 0x3ca   :  { %593 = vsyncpa [#allocation3], 1 }
 0x3cb   :  { %595 = vsyncpa [#allocation3 + $0x1], 1 }

</bundles_post_ra>
